<compile_context>
chip_gen: v7x
topology: tpu7x:2x2x1
jax: 0.10.0
libtpu: 0.0.40
codegen_flags: <defaults>
</compile_context>

<pallas_src>
import functools
import jax
import jax.numpy as jnp
from jax.experimental import pallas as pl
from jax.experimental.pallas import tpu as pltpu

LANE = 128     # TPU lane width: feature dim is padded to a multiple of this
SUBLANE = 8    # row-tile granularity


def _round_up(x, m):
    return (x + m - 1) // m * m


def nonlin_mapping_kernel(x_ref, mean_ref, inv_sigma_ref,
                          w1t_ref, b1_ref, w2t_ref, b2_ref, o_ref):
    # Normalize (broadcast (1, dp) over (tm, dp)); divide pre-folded into a mul.
    xn = (x_ref[...] - mean_ref[...]) * inv_sigma_ref[...]
    # NonlinBlock: Linear (weights pre-transposed to (in, out)) + ReLU.
    h = jnp.dot(xn, w1t_ref[...], preferred_element_type=jnp.float32) + b1_ref[...]
    h = jnp.maximum(h, 0.0)
    # lin_mapping: Linear.
    res = jnp.dot(h, w2t_ref[...], preferred_element_type=jnp.float32) + b2_ref[...]
    # Residual connection on the normalized input.
    o_ref[...] = (xn + res).astype(o_ref.dtype)


def prepare_params(norm_mean, norm_sigma, w1, b1, w2, b2):
    """One-time parameter prep: 1/sigma, W^T, zero-pad feature dim to LANE.

    w1, w2 are in PyTorch (out, in) layout; mean/sigma/b1/b2 are (d,).
    Padding is exact: padded mean/b rows are 0, padded inv_sigma is 1, padded
    weight rows/cols are 0, so the first d output columns are unchanged.
    """
    d = norm_mean.shape[0]
    dp = _round_up(max(d, LANE), LANE)
    pad = dp - d

    def pad_vec(v, fill):
        return jnp.pad(v.reshape(1, d).astype(jnp.float32),
                       ((0, 0), (0, pad)), constant_values=fill)

    def pad_mat(m):  # (out, in) -> transposed + padded (dp, dp), (in, out) layout
        return jnp.pad(m.T.astype(jnp.float32), ((0, pad), (0, pad)))

    return dict(
        mean=pad_vec(norm_mean, 0.0),
        inv_sigma=pad_vec(1.0 / norm_sigma, 1.0),
        w1t=pad_mat(w1), b1=pad_vec(b1, 0.0),
        w2t=pad_mat(w2), b2=pad_vec(b2, 0.0),
    )


def nonlin_mapping(x, mean, inv_sigma, w1t, b1, w2t, b2, *, block_rows=512):
    """x: (N, d) f32. Remaining args are the padded params from prepare_params."""
    N, d = x.shape
    dp = mean.shape[1]

    # Row tile: multiple of 8, capped at block_rows; pad N up to a multiple.
    tm = min(block_rows, _round_up(N, SUBLANE))
    n_pad = _round_up(N, tm)
    x_p = jnp.pad(x.astype(jnp.float32), ((0, n_pad - N), (0, dp - d)))

    row_spec = pl.BlockSpec((tm, dp), lambda i: (i, 0))
    resident = lambda shape: pl.BlockSpec(shape, lambda i: (0, 0))

    out_p = pl.pallas_call(
        nonlin_mapping_kernel,
        out_shape=jax.ShapeDtypeStruct((n_pad, dp), jnp.float32),
        grid=(n_pad // tm,),
        in_specs=[
            row_spec,             # x tile, streamed
            resident((1, dp)),    # mean
            resident((1, dp)),    # 1/sigma
            resident((dp, dp)),   # W1^T
            resident((1, dp)),    # b1
            resident((dp, dp)),   # W2^T
            resident((1, dp)),    # b2
        ],
        out_specs=row_spec,
        compiler_params=pltpu.CompilerParams(
            dimension_semantics=("parallel",)),
    )(x_p, mean, inv_sigma, w1t, b1, w2t, b2)

    return out_p[:N, :d].astype(x.dtype)


def reference(x, norm_mean, norm_sigma, w1, b1, w2, b2):
    xn = (x - norm_mean) / norm_sigma
    h = jnp.maximum(xn @ w1.T + b1, 0.0)
    res = h @ w2.T + b2
    return xn + res


if __name__ == "__main__":
    key = jax.random.PRNGKey(0)
    N, d = 8, 32  # small shapes; d = feature dim of NonlinMapping(d)

    k_x, k_w1, k_b1, k_w2, k_b2, k_mean, k_sigma = jax.random.split(key, 7)

    x = jax.random.normal(k_x, (N, d), dtype=jnp.float32)

    # Deterministic parameter init mimicking nn.Linear (uniform +/- 1/sqrt(d)).
    bound = 1.0 / jnp.sqrt(jnp.float32(d))
    w1 = jax.random.uniform(k_w1, (d, d), jnp.float32, -bound, bound)  # (out, in)
    b1 = jax.random.uniform(k_b1, (d,), jnp.float32, -bound, bound)
    w2 = jax.random.uniform(k_w2, (d, d), jnp.float32, -bound, bound)  # (out, in)
    b2 = jax.random.uniform(k_b2, (d,), jnp.float32, -bound, bound)

    # Registered buffers (perturbed so the normalization path is exercised).
    norm_mean = 0.1 * jax.random.normal(k_mean, (d,), dtype=jnp.float32)
    norm_sigma = jnp.ones((d,), jnp.float32) + 0.05 * jax.random.uniform(
        k_sigma, (d,), jnp.float32)

    # One-time param prep (transpose / reciprocal / pad), then a jitted forward
    # whose only per-call XLA work is the x pad + output slice around the kernel.
    params = prepare_params(norm_mean, norm_sigma, w1, b1, w2, b2)
    fwd = jax.jit(functools.partial(nonlin_mapping, **params))

    out = jax.block_until_ready(fwd(x))

    ref = reference(x, norm_mean, norm_sigma, w1, b1, w2, b2)
    assert out.shape == (N, d)
    assert jnp.allclose(out, ref, atol=1e-5, rtol=1e-5), (
        f"max abs err {jnp.max(jnp.abs(out - ref))}")

    print("KERNEL_OK")
</pallas_src>

<mosaic_0001>
module attributes {stable_mosaic.version = 11 : i64} {
  func.func @nonlin_mapping_kernel(%arg0: i32, %arg1: memref<8x128xf32, #tpu.memory_space<vmem>>, %arg2: memref<1x128xf32, #tpu.memory_space<vmem>>, %arg3: memref<1x128xf32, #tpu.memory_space<vmem>>, %arg4: memref<128x128xf32, #tpu.memory_space<vmem>>, %arg5: memref<1x128xf32, #tpu.memory_space<vmem>>, %arg6: memref<128x128xf32, #tpu.memory_space<vmem>>, %arg7: memref<1x128xf32, #tpu.memory_space<vmem>>, %arg8: memref<8x128xf32, #tpu.memory_space<vmem>>) attributes {dimension_semantics = [#tpu.dimension_semantics<parallel>], iteration_bounds = array<i64: 1>, scalar_prefetch = 0 : i64, scratch_operands = 0 : i64, tpu.core_type = #tpu.core_type<tc>, window_params = [{transform_indices = @transform_0, window_bounds = array<i64: 8, 128>}, {pipeline_mode = #tpu.pipeline_mode<synchronous>, transform_indices = @transform_1, window_bounds = array<i64: 1, 128>}, {pipeline_mode = #tpu.pipeline_mode<synchronous>, transform_indices = @transform_2, window_bounds = array<i64: 1, 128>}, {pipeline_mode = #tpu.pipeline_mode<synchronous>, transform_indices = @transform_3, window_bounds = array<i64: 128, 128>}, {pipeline_mode = #tpu.pipeline_mode<synchronous>, transform_indices = @transform_4, window_bounds = array<i64: 1, 128>}, {pipeline_mode = #tpu.pipeline_mode<synchronous>, transform_indices = @transform_5, window_bounds = array<i64: 128, 128>}, {pipeline_mode = #tpu.pipeline_mode<synchronous>, transform_indices = @transform_6, window_bounds = array<i64: 1, 128>}, {transform_indices = @transform_7, window_bounds = array<i64: 8, 128>}]} {
    %c0 = arith.constant 0 : index
    %c0_0 = arith.constant 0 : index
    %0 = vector.load %arg1[%c0, %c0_0] : memref<8x128xf32, #tpu.memory_space<vmem>>, vector<8x128xf32>
    %c0_1 = arith.constant 0 : index
    %c0_2 = arith.constant 0 : index
    %1 = vector.load %arg2[%c0_1, %c0_2] : memref<1x128xf32, #tpu.memory_space<vmem>>, vector<1x128xf32>
    %2 = vector.broadcast %1 : vector<1x128xf32> to vector<8x128xf32>
    %3 = arith.subf %0, %2 : vector<8x128xf32>
    %c0_3 = arith.constant 0 : index
    %c0_4 = arith.constant 0 : index
    %4 = vector.load %arg3[%c0_3, %c0_4] : memref<1x128xf32, #tpu.memory_space<vmem>>, vector<1x128xf32>
    %5 = vector.broadcast %4 : vector<1x128xf32> to vector<8x128xf32>
    %6 = arith.mulf %3, %5 : vector<8x128xf32>
    %c0_5 = arith.constant 0 : index
    %c0_6 = arith.constant 0 : index
    %7 = vector.load %arg4[%c0_5, %c0_6] : memref<128x128xf32, #tpu.memory_space<vmem>>, vector<128x128xf32>
    %cst = arith.constant dense<0.000000e+00> : vector<8x128xf32>
    %8 = tpu.matmul %6, %7, %cst {dimension_numbers = #tpu.dot_dimension_numbers<[1], [0], [0], [1], [0, 0, 1, 1], [], []>} : vector<8x128xf32>, vector<128x128xf32>, vector<8x128xf32> -> vector<8x128xf32>
    %c0_7 = arith.constant 0 : index
    %c0_8 = arith.constant 0 : index
    %9 = vector.load %arg5[%c0_7, %c0_8] : memref<1x128xf32, #tpu.memory_space<vmem>>, vector<1x128xf32>
    %10 = vector.broadcast %9 : vector<1x128xf32> to vector<8x128xf32>
    %11 = arith.addf %8, %10 : vector<8x128xf32>
    %cst_9 = arith.constant 0.000000e+00 : f32
    %12 = vector.broadcast %cst_9 : f32 to vector<8x128xf32>
    %13 = arith.maximumf %11, %12 : vector<8x128xf32>
    %c0_10 = arith.constant 0 : index
    %c0_11 = arith.constant 0 : index
    %14 = vector.load %arg6[%c0_10, %c0_11] : memref<128x128xf32, #tpu.memory_space<vmem>>, vector<128x128xf32>
    %cst_12 = arith.constant dense<0.000000e+00> : vector<8x128xf32>
    %15 = tpu.matmul %13, %14, %cst_12 {dimension_numbers = #tpu.dot_dimension_numbers<[1], [0], [0], [1], [0, 0, 1, 1], [], []>} : vector<8x128xf32>, vector<128x128xf32>, vector<8x128xf32> -> vector<8x128xf32>
    %c0_13 = arith.constant 0 : index
    %c0_14 = arith.constant 0 : index
    %16 = vector.load %arg7[%c0_13, %c0_14] : memref<1x128xf32, #tpu.memory_space<vmem>>, vector<1x128xf32>
    %17 = vector.broadcast %16 : vector<1x128xf32> to vector<8x128xf32>
    %18 = arith.addf %15, %17 : vector<8x128xf32>
    %19 = arith.addf %6, %18 : vector<8x128xf32>
    %c0_15 = arith.constant 0 : index
    %c0_16 = arith.constant 0 : index
    %20 = vector.load %arg8[%c0_15, %c0_16] : memref<8x128xf32, #tpu.memory_space<vmem>>, vector<8x128xf32>
    tpu.vector_store %arg8[%c0_15, %c0_16], %19 {strides = array<i32>} : memref<8x128xf32, #tpu.memory_space<vmem>>, vector<8x128xf32>,
    return
  }
  func.func @transform_0(%arg0: i32) -> (i32, i32) {
    %c0_i32 = arith.constant 0 : i32
    %c0_i32_0 = arith.constant 0 : i32
    return %arg0, %c0_i32 : i32, i32
  }
  func.func @transform_1(%arg0: i32) -> (i32, i32) {
    %c0_i32 = arith.constant 0 : i32
    %c0_i32_0 = arith.constant 0 : i32
    %c0_i32_1 = arith.constant 0 : i32
    return %c0_i32, %c0_i32_0 : i32, i32
  }
  func.func @transform_2(%arg0: i32) -> (i32, i32) {
    %c0_i32 = arith.constant 0 : i32
    %c0_i32_0 = arith.constant 0 : i32
    %c0_i32_1 = arith.constant 0 : i32
    return %c0_i32, %c0_i32_0 : i32, i32
  }
  func.func @transform_3(%arg0: i32) -> (i32, i32) {
    %c0_i32 = arith.constant 0 : i32
    %c0_i32_0 = arith.constant 0 : i32
    %c0_i32_1 = arith.constant 0 : i32
    return %c0_i32, %c0_i32_0 : i32, i32
  }
  func.func @transform_4(%arg0: i32) -> (i32, i32) {
    %c0_i32 = arith.constant 0 : i32
    %c0_i32_0 = arith.constant 0 : i32
    %c0_i32_1 = arith.constant 0 : i32
    return %c0_i32, %c0_i32_0 : i32, i32
  }
  func.func @transform_5(%arg0: i32) -> (i32, i32) {
    %c0_i32 = arith.constant 0 : i32
    %c0_i32_0 = arith.constant 0 : i32
    %c0_i32_1 = arith.constant 0 : i32
    return %c0_i32, %c0_i32_0 : i32, i32
  }
  func.func @transform_6(%arg0: i32) -> (i32, i32) {
    %c0_i32 = arith.constant 0 : i32
    %c0_i32_0 = arith.constant 0 : i32
    %c0_i32_1 = arith.constant 0 : i32
    return %c0_i32, %c0_i32_0 : i32, i32
  }
  func.func @transform_7(%arg0: i32) -> (i32, i32) {
    %c0_i32 = arith.constant 0 : i32
    %c0_i32_0 = arith.constant 0 : i32
    return %arg0, %c0_i32 : i32, i32
  }
}

</mosaic_0001>

<bundles_post_ra>
// kernel: nonlin_mapping.1
= control target key start
LH: loop header
LB: loop body
LE: loop exit
PB: predicated region body
PF: predicated region fallthrough
CT: control target
= control target key end

     0   :  { %12 = vsyncpa [#allocation3], 0  ;;  %s628_s0 = inlined_call_operand.vmem [shape: f32[8,128], index: 0, kind: input, shape index: {}]   ;;  %s629_s1 = inlined_call_operand.vmem [shape: f32[1,128], index: 1, kind: input, shape index: {}]   ;;  %s630_s2 = inlined_call_operand.vmem [shape: f32[1,128], index: 2, kind: input, shape index: {}]   ;;  %s631_s3 = inlined_call_operand.hbm [shape: f32[128,128], index: 3, kind: input, shape index: {}]   ;;  %s632_s4 = inlined_call_operand.vmem [shape: f32[1,128], index: 4, kind: input, shape index: {}]   ;;  %s633_s5 = inlined_call_operand.hbm [shape: f32[128,128], index: 5, kind: input, shape index: {}]   ;;  %s634_s6 = inlined_call_operand.vmem [shape: f32[1,128], index: 6, kind: input, shape index: {}]   ;;  %s635_s7 = inlined_call_operand.hbm [shape: f32[8,128], index: 7, kind: output, shape index: {}]  }
   0x1   :  { %13 = vsyncpa [#allocation6], 0 }
   0x2   :  { %14 = vsyncpa [#allocation4], 0  ;;  %s513_s24 = smov [#allocation2]   ;;  %s441_s28 = scalar_lea.hbm %s631_s3, 2048 }
   0x3   :  { %s26_s25 = sshll.u32 %s513_s24, 4  ;;  %p442_p0 = scmp.ne.s32.totalorder %s631_s3, %s441_s28  ;;  %s27_s25 = int_to_ptr.vmem [resolvable:$true] %s26_s25 }
   0x4   :  { %p445_p1 = scmp.lt.u32.totalorder %s441_s28, %s631_s3 }
   0x6   :  { %p447_p2 = pnand %p445_p1, %p442_p0 }
   0x8   :  { %450 = shalt.err (!%p447_p2)
}
   0x9   :  { %s451_s10 = scalar_lea.vmem %s27_s25, 2048  ;;  %p456_p4 = scmp.lt.s32.totalorder %s27_s25, %s27_s25 }
   0xa   :  { %p452_p3 = scmp.ne.s32.totalorder %s27_s25, %s451_s10  ;;  %p457_p5 = scmp.lt.s32.totalorder %s451_s10, %s451_s10 }
   0xc   :  { %p458_p6 = por %p457_p5, %p456_p4 }
   0xe   :  { %p459_p7 = pnand %p458_p6, %p452_p3 }
  0x10   :  { %462 = shalt.err (!%p459_p7)
}
  0x11   :  { %s514_s11 = smov 128   ;;  %s515_s12 = smov 8  }
  0x12   :  { %32 = dma.hbm_to_vmem [thread:$0]  %s631_s3, 2048, %s27_s25, [#allocation3], %s514_s11, %s514_s11, %s515_s12  }
  0x13   :  { %s516_s15 = smov [#allocation5]   ;;  %s463_s19 = scalar_lea.hbm %s633_s5, 2048 }
  0x14   :  { %s40_s16 = sshll.u32 %s516_s15, 4  ;;  %p464_p8 = scmp.ne.s32.totalorder %s633_s5, %s463_s19  ;;  %s41_s16 = int_to_ptr.vmem [resolvable:$true] %s40_s16 }
  0x15   :  { %p467_p9 = scmp.lt.u32.totalorder %s463_s19, %s633_s5 }
  0x17   :  { %p469_p10 = pnand %p467_p9, %p464_p8 }
  0x19   :  { %472 = shalt.err (!%p469_p10)
}
  0x1a   :  { %s473_s24 = scalar_lea.vmem %s41_s16, 2048  ;;  %p478_p12 = scmp.lt.s32.totalorder %s41_s16, %s41_s16 }
  0x1b   :  { %p474_p11 = scmp.ne.s32.totalorder %s41_s16, %s473_s24  ;;  %p479_p13 = scmp.lt.s32.totalorder %s473_s24, %s473_s24 }
  0x1d   :  { %p480_p0 = por %p479_p13, %p478_p12 }
  0x1f   :  { %p481_p1 = pnand %p480_p0, %p474_p11 }
  0x21   :  { %484 = shalt.err (!%p481_p1)
}
  0x22   :  { %46 = dma.hbm_to_vmem [thread:$0]  %s633_s5, 2048, %s41_s16, [#allocation6], %s514_s11, %s514_s11, %s515_s12  }
  0x23   :  { %507 = dma.done.wait [#allocation3], 2048  }
  0x24   :  { %508 = vsyncadd [#allocation3], 4294965248 }
  0x25   :  { %509 = dma.done.wait [#allocation6], 2048  }
  0x26   :  { %510 = vsyncadd [#allocation6], 4294965248  ;;  %v517_v0 = vmov 0.0|0.0   ;;  %vm518_vm0 = vmmov 0   ;;  %v519_v1 = vmov 0.0   ;;  %v72_v2 = vld [vmem:[#allocation2] sm:$0xff] }
  0x27   :  { %385 = vmatprep.subr.bf16.mxu0 %v517_v0  ;;  %347 = vmatprep.mubr.msk.f32.mxu0 %vm518_vm0, %v519_v1  ;;  %v73_v3 = vld [vmem:[#allocation2 + $0x8] sm:$0xff]  ;;  %v74_v4 = vld [vmem:[#allocation2 + $0x10] sm:$0xff]  ;;  %v75_v6 = vld [vmem:[#allocation2 + $0x18] sm:$0xff]  ;;  %s520_s9 = smov [#allocation7]  }
  0x28   :  { %409 = vmatprep.subr.bf16.mxu1 %v517_v0  ;;  %382 = vmatprep.mubr.msk.f32.mxu1 %vm518_vm0, %v519_v1  ;;  %v386_v5 = vpack.c.bf16 %v73_v3, %v72_v2  ;;  %v389_v7 = vpack.c.bf16 %v75_v6, %v74_v4  ;;  %v76_v8 = vld [vmem:[#allocation2 + $0x20] sm:$0xff]  ;;  %v77_v9 = vld [vmem:[#allocation2 + $0x28] sm:$0xff]  ;;  %v168_v14 = vld [vmem:[#allocation5 + $0x10] sm:$0xff]  ;;  %s267_s10 = sshll.u32 %s520_s9, 4  ;;  %s268_s10 = int_to_ptr.vmem [resolvable:$true] %s267_s10 }
  0x29   :  { %v166_v10 = vld [vmem:[#allocation5] sm:$0xff]  ;;  %v167_v11 = vld [vmem:[#allocation5 + $0x8] sm:$0xff]  ;;  %v392_v12 = vpack.c.bf16 %v77_v9, %v76_v8  ;;  %v169_v15 = vld [vmem:[#allocation5 + $0x18] sm:$0xff]  ;;  %s485_s11 = scalar_lea.vmem %s268_s10, 128  ;;  %p490_p3 = scmp.lt.s32.totalorder %s268_s10, %s268_s10 }
  0x2a   :  { %387 = vmatpush3.bf16.msra.mxu0 %v386_v5  ;;  %v410_v13 = vpack.c.bf16 %v167_v11, %v166_v10  ;;  %v78_v16 = vld [vmem:[#allocation2 + $0x30] sm:$0xff]  ;;  %v79_v17 = vld [vmem:[#allocation2 + $0x38] sm:$0xff]  ;;  %v413_v18 = vpack.c.bf16 %v169_v15, %v168_v14  ;;  %v170_v19 = vld [vmem:[#allocation5 + $0x20] sm:$0xff]  ;;  %p486_p2 = scmp.ne.s32.totalorder %s268_s10, %s485_s11  ;;  %p491_p4 = scmp.lt.s32.totalorder %s485_s11, %s485_s11 }
  0x2b   :  { %388 = vmatprep.subr.bf16.mxu0 %v517_v0  ;;  %v171_v20 = vld [vmem:[#allocation5 + $0x28] sm:$0xff]  ;;  %v395_v21 = vpack.c.bf16 %v79_v17, %v78_v16  ;;  %v80_v22 = vld [vmem:[#allocation2 + $0x40] sm:$0xff]  ;;  %v172_v25 = vld [vmem:[#allocation5 + $0x30] sm:$0xff] }
  0x2c   :  { %411 = vmatpush3.bf16.msra.mxu1 %v410_v13  ;;  %v81_v23 = vld [vmem:[#allocation2 + $0x48] sm:$0xff]  ;;  %v416_v24 = vpack.c.bf16 %v171_v20, %v170_v19  ;;  %v173_v26 = vld [vmem:[#allocation5 + $0x38] sm:$0xff]  ;;  %v82_v28 = vld [vmem:[#allocation2 + $0x50] sm:$0xff]  ;;  %p492_p5 = por %p491_p4, %p490_p3 }
  0x2d   :  { %412 = vmatprep.subr.bf16.mxu1 %v517_v0  ;;  %v398_v27 = vpack.c.bf16 %v81_v23, %v80_v22  ;;  %v83_v29 = vld [vmem:[#allocation2 + $0x58] sm:$0xff]  ;;  %v419_v30 = vpack.c.bf16 %v173_v26, %v172_v25  ;;  %v174_v31 = vld [vmem:[#allocation5 + $0x40] sm:$0xff]  ;;  %v175_v32 = vld [vmem:[#allocation5 + $0x48] sm:$0xff] }
  0x2e   :  { %390 = vmatpush3.bf16.msra.mxu0 %v389_v7  ;;  %v401_v33 = vpack.c.bf16 %v83_v29, %v82_v28  ;;  %v84_v34 = vld [vmem:[#allocation2 + $0x60] sm:$0xff]  ;;  %v85_v35 = vld [vmem:[#allocation2 + $0x68] sm:$0xff]  ;;  %v422_v36 = vpack.c.bf16 %v175_v32, %v174_v31  ;;  %v176_v37 = vld [vmem:[#allocation5 + $0x50] sm:$0xff]  ;;  %p493_p6 = pnand %p492_p5, %p486_p2 }
  0x2f   :  { %391 = vmatprep.subr.bf16.mxu0 %v517_v0  ;;  %v177_v38 = vld [vmem:[#allocation5 + $0x58] sm:$0xff]  ;;  %v404_v39 = vpack.c.bf16 %v85_v35, %v84_v34  ;;  %v55_v40 = vld [vmem:[%s628_s0] sm:$0xff]  ;;  %v86_v42 = vld [vmem:[#allocation2 + $0x70] sm:$0xff] }
  0x30   :  { %414 = vmatpush3.bf16.msra.mxu1 %v413_v18  ;;  %v277_v41 = vld [vmem:[%s629_s1] ss:$0 sm:$0xff]  ;;  %v87_v43 = vld [vmem:[#allocation2 + $0x78] sm:$0xff]  ;;  %v425_v44 = vpack.c.bf16 %v177_v38, %v176_v37  ;;  %v179_v47 = vld [vmem:[#allocation5 + $0x68] sm:$0xff] }
  0x31   :  { %415 = vmatprep.subr.bf16.mxu1 %v517_v0  ;;  %v63_v45 = vsub.f32 %v55_v40, %v277_v41  ;;  %v178_v46 = vld [vmem:[#allocation5 + $0x60] sm:$0xff]  ;;  %v407_v48 = vpack.c.bf16 %v87_v43, %v86_v42  ;;  %v180_v52 = vld [vmem:[#allocation5 + $0x70] sm:$0xff]  ;;  %v181_v53 = vld [vmem:[#allocation5 + $0x78] sm:$0xff] }
  0x32   :  { %393 = vmatpush3.bf16.msra.mxu0 %v392_v12  ;;  %v278_v49 = vld [vmem:[%s630_s2] ss:$0 sm:$0xff]  ;;  %v428_v50 = vpack.c.bf16 %v179_v47, %v178_v46  ;;  %v431_v54 = vpack.c.bf16 %v181_v53, %v180_v52 }
  0x33   :  { %394 = vmatprep.subr.bf16.mxu0 %v517_v0  ;;  %v71_v51 = vmul.f32 %v278_v49, %v63_v45  ;;  %v279_v55 = vld [vmem:[%s632_s4] ss:$0 sm:$0xff] }
  0x34   :  { %417 = vmatpush3.bf16.msra.mxu1 %v416_v24  ;;  %v280_v60 = vld [vmem:[%s634_s6] ss:$0 sm:$0xff] }
  0x35   :  { %418 = vmatprep.subr.bf16.mxu1 %v517_v0 }
  0x36   :  { %396 = vmatpush3.bf16.msra.mxu0 %v395_v21 }
  0x37   :  { %397 = vmatprep.subr.bf16.mxu0 %v517_v0 }
  0x38   :  { %420 = vmatpush3.bf16.msra.mxu1 %v419_v30 }
  0x39   :  { %421 = vmatprep.subr.bf16.mxu1 %v517_v0 }
  0x3a   :  { %399 = vmatpush3.bf16.msra.mxu0 %v398_v27 }
  0x3b   :  { %400 = vmatprep.subr.bf16.mxu0 %v517_v0 }
  0x3c   :  { %423 = vmatpush3.bf16.msra.mxu1 %v422_v36 }
  0x3d   :  { %424 = vmatprep.subr.bf16.mxu1 %v517_v0 }
  0x3e   :  { %402 = vmatpush3.bf16.msra.mxu0 %v401_v33 }
  0x3f   :  { %403 = vmatprep.subr.bf16.mxu0 %v517_v0 }
  0x40   :  { %426 = vmatpush3.bf16.msra.mxu1 %v425_v44 }
  0x41   :  { %427 = vmatprep.subr.bf16.mxu1 %v517_v0 }
  0x42   :  { %405 = vmatpush3.bf16.msra.mxu0 %v404_v39 }
  0x43   :  { %406 = vmatprep.subr.bf16.mxu0 %v517_v0 }
  0x44   :  { %429 = vmatpush3.bf16.msra.mxu1 %v428_v50 }
  0x45   :  { %430 = vmatprep.subr.bf16.mxu1 %v517_v0 }
  0x46   :  { %408 = vmatpush3.bf16.msra.mxu0 %v407_v48 }
  0x48   :  { %432 = vmatpush3.bf16.msra.mxu1 %v431_v54 }
  0x49   :  { %348 = vmatmul.mubr.f32.vlgmr.msra.gmra.mrb[0].mxu0 %v71_v51 }
 0x11c   :  { %v161_v56 = vpop.f32.mrb[0].mxu0 }
 0x11d   :  { %v162_v57 = vadd.f32 %v279_v55, %v161_v56  ;;  %v349_v58 = vpop.f32.mrb[1].mxu0 }
 0x11f   :  { %v165_v59 = vmax.f32 %v162_v57, 0.0 }
 0x121   :  { %383 = vmatmul.mubr.f32.vlgmr.msra.gmra.mrb[0].mxu1 %v165_v59 }
 0x1f4   :  { %v255_v61 = vpop.f32.mrb[0].mxu1 }
 0x1f5   :  { %v256_v62 = vadd.f32 %v280_v60, %v255_v61  ;;  %v384_v63 = vpop.f32.mrb[1].mxu1 }
 0x1f7   :  { %v259_v0 = vadd.f32 %v256_v62, %v71_v51 }
 0x1f9   :  { %260 = vst [vmem:[#allocation7] sm:$0xff] %v259_v0 }
 0x1fa   :  { %496 = shalt.err (!%p493_p6)
}
 0x1fb   :  { %s497_s13 = scalar_lea.hbm %s635_s7, 128 }
 0x1fc   :  { %p498_p7 = scmp.ne.s32.totalorder %s635_s7, %s497_s13  ;;  %p501_p8 = scmp.lt.u32.totalorder %s497_s13, %s635_s7 }
 0x1fe   :  { %p503_p9 = pnand %p501_p8, %p498_p7 }
 0x200   :  { %506 = shalt.err (!%p503_p9)
}
 0x201   :  { %270 = dma.vmem_to_hbm [thread:$0]  %s268_s10, 128, %s635_s7, [#allocation4]  }
 0x202   :  { %511 = dma.done.wait [#allocation4], 128  }
 0x203   :  { %512 = vsyncadd [#allocation4], 4294967168 }
 0x204   :  { %274 = vsyncpa [#allocation3], 1 }
 0x205   :  { %275 = vsyncpa [#allocation6], 1 }
 0x206   :  { %276 = vsyncpa [#allocation4], 1 }

</bundles_post_ra>
